<compile_context>
chip_gen: v6e
topology: v6e:2x2x1
jax: 0.10.0
libtpu: 0.0.40
codegen_flags: <defaults>
</compile_context>

<pallas_src>
import jax
import jax.numpy as jnp
from jax import lax
from jax.experimental import pallas as pl
from jax.experimental.pallas import tpu as pltpu

N = 15   # number of input samples (matches the 15-element x in the file)
H = 32   # hidden width of each Device_* MLP


# ---------------------------------------------------------------------------
# Kernel
# ---------------------------------------------------------------------------
def multidevice_kernel(x_ref, w_ref, b_ref, o_ref):
    # x_ref : (N, 1) f32  VMEM
    # w_ref : (8, 2H) f32 VMEM packed parameter slab
    #   row 0: [w1_in  | w2_in ]     row 4: [w3_in  | 0]
    #   row 1: [b1_in  | b2_in ]     row 5: [b3_in  | 0]
    #   row 2: [w1_out | 0     ]     row 6: [w3_out | 0]
    #   row 3: [0      | w2_out]     row 7: [0      | 0]
    # b_ref : (3,) f32 SMEM = [b1_out, b2_out, b3_out]
    x = x_ref[...]                                   # (N, 1)

    w12_in = w_ref[0:1, :]                           # (1, 2H)
    b12_in = w_ref[1:2, :]
    w1_out = w_ref[2:3, :]
    w2_out = w_ref[3:4, :]
    w3_in  = w_ref[4:5, :]
    b3_in  = w_ref[5:6, :]
    w3_out = w_ref[6:7, :]

    # Fused device_1 / device_2 hidden layer: one (N, 2H) VPU pass.
    h12 = jnp.maximum(x * w12_in + b12_in, 0.0)                       # (N, 2H)
    x1 = jnp.sum(h12 * w1_out, axis=1, keepdims=True) + b_ref[0]      # (N, 1)
    x2 = jnp.sum(h12 * w2_out, axis=1, keepdims=True) + b_ref[1]      # (N, 1)

    # F.cosine_similarity(x1.view(-1), x2.view(-1), dim=0), eps = 1e-8.
    # max(sqrt(s), eps) == sqrt(max(s, eps^2)), so use EUP rsqrt instead of
    # sqrt + divide.
    dot = jnp.sum(x1 * x2)
    s1 = jnp.sum(x1 * x1)
    s2 = jnp.sum(x2 * x2)
    eps2 = jnp.float32(1e-16)                        # (1e-8)**2
    sim = dot * lax.rsqrt(jnp.maximum(s1, eps2)) * lax.rsqrt(jnp.maximum(s2, eps2))

    # y = sim*x1 + (1 - sim)*x2  ==  x2 + sim*(x1 - x2)
    y = x2 + sim * (x1 - x2)

    # device_3: lanes >= H of w3_in/b3_in/w3_out are zero, so the padded lanes
    # contribute exactly 0 to the reduction -- no lane slicing needed.
    h3 = jnp.maximum(y * w3_in + b3_in, 0.0)                          # (N, 2H)
    o_ref[...] = jnp.sum(h3 * w3_out, axis=1, keepdims=True) + b_ref[2]


# ---------------------------------------------------------------------------
# Wrapper
# ---------------------------------------------------------------------------
def multidevice_forward(x, param_slab, out_biases):
    vmem = pl.BlockSpec(memory_space=pltpu.MemorySpace.VMEM)
    smem = pl.BlockSpec(memory_space=pltpu.MemorySpace.SMEM)
    return pl.pallas_call(
        multidevice_kernel,
        out_shape=jax.ShapeDtypeStruct((x.shape[0], 1), jnp.float32),
        in_specs=[vmem, vmem, smem],
        out_specs=vmem,
    )(x, param_slab, out_biases)


def pack_params(params):
    """Pack 12 per-device tensors into one (8, 2H) VMEM slab + (3,) SMEM vector."""
    (w1a, b1a, w1b, b1b,
     w2a, b2a, w2b, b2b,
     w3a, b3a, w3b, b3b) = params
    z = jnp.zeros((1, H), jnp.float32)
    slab = jnp.concatenate([
        jnp.concatenate([w1a, w2a], axis=1),          # row 0
        jnp.concatenate([b1a, b2a], axis=1),          # row 1
        jnp.concatenate([w1b, z], axis=1),            # row 2
        jnp.concatenate([z, w2b], axis=1),            # row 3
        jnp.concatenate([w3a, z], axis=1),            # row 4
        jnp.concatenate([b3a, z], axis=1),            # row 5
        jnp.concatenate([w3b, z], axis=1),            # row 6
        jnp.zeros((1, 2 * H), jnp.float32),           # row 7 (sublane pad)
    ], axis=0)                                        # (8, 2H)
    out_biases = jnp.concatenate(
        [b1b.reshape(-1), b2b.reshape(-1), b3b.reshape(-1)])  # (3,)
    return slab, out_biases


# ---------------------------------------------------------------------------
# Parameter init + pure-JAX reference (unfused, torch-style formulas)
# ---------------------------------------------------------------------------
def init_params(key):
    ks = jax.random.split(key, 12)

    def dev(k0, k1, k2, k3):
        w_in = jax.random.normal(k0, (1, H), jnp.float32) * 0.5    # Linear(1,H).weight
        b_in = jax.random.normal(k1, (1, H), jnp.float32) * 0.1    # Linear(1,H).bias
        w_out = jax.random.normal(k2, (1, H), jnp.float32) * 0.5   # Linear(H,1).weight
        b_out = jax.random.normal(k3, (1, 1), jnp.float32) * 0.1   # Linear(H,1).bias
        return [w_in, b_in, w_out, b_out]

    p = []
    p += dev(*ks[0:4])    # device_1
    p += dev(*ks[4:8])    # device_2
    p += dev(*ks[8:12])   # device_3
    return p


def _mlp_ref(x, w_in, b_in, w_out, b_out):
    h = jnp.maximum(x * w_in + b_in, 0.0)                      # (N, H)
    return jnp.sum(h * w_out, axis=1, keepdims=True) + b_out   # (N, 1)


def reference_forward(x, params):
    (w1a, b1a, w1b, b1b, w2a, b2a, w2b, b2b, w3a, b3a, w3b, b3b) = params
    x1 = _mlp_ref(x, w1a, b1a, w1b, b1b)
    x2 = _mlp_ref(x, w2a, b2a, w2b, b2b)
    dot = jnp.sum(x1 * x2)
    n1 = jnp.sqrt(jnp.sum(x1 * x1))
    n2 = jnp.sqrt(jnp.sum(x2 * x2))
    sim = dot / (jnp.maximum(n1, 1e-8) * jnp.maximum(n2, 1e-8))
    y = sim * x1 + (1.0 - sim) * x2
    return _mlp_ref(y, w3a, b3a, w3b, b3b)


if __name__ == "__main__":
    key = jax.random.PRNGKey(0)
    params = init_params(key)
    slab, out_biases = pack_params(params)

    # same input as the torch script: x = [-7, ..., 7] as a (15, 1) column
    x = jnp.arange(-7, 8, dtype=jnp.float32).reshape(-1, 1)   # (15, 1)

    out = multidevice_forward(x, slab, out_biases)
    out = jax.block_until_ready(out)

    ref = reference_forward(x, params)
    assert out.shape == (N, 1) and out.dtype == jnp.float32
    assert jnp.allclose(out, ref, rtol=1e-4, atol=1e-3), "mismatch vs. JAX reference"

    print("KERNEL_OK")
</pallas_src>

<mosaic_0001>
module attributes {stable_mosaic.version = 11 : i64} {
  func.func @multidevice_kernel(%arg0: memref<15x1xf32, #tpu.memory_space<vmem>>, %arg1: memref<8x64xf32, #tpu.memory_space<vmem>>, %arg2: memref<3xf32, #tpu.memory_space<smem>>, %arg3: memref<15x1xf32, #tpu.memory_space<vmem>>) attributes {dimension_semantics = [], scalar_prefetch = 0 : i64, scratch_operands = 0 : i64, tpu.core_type = #tpu.core_type<tc>} {
    %c0 = arith.constant 0 : index
    %c0_0 = arith.constant 0 : index
    %0 = vector.load %arg0[%c0, %c0_0] : memref<15x1xf32, #tpu.memory_space<vmem>>, vector<15x1xf32>
    %c0_1 = arith.constant 0 : index
    %c0_2 = arith.constant 0 : index
    %1 = vector.load %arg1[%c0_1, %c0_2] : memref<8x64xf32, #tpu.memory_space<vmem>>, vector<1x64xf32>
    %c1 = arith.constant 1 : index
    %c0_3 = arith.constant 0 : index
    %2 = vector.load %arg1[%c1, %c0_3] : memref<8x64xf32, #tpu.memory_space<vmem>>, vector<1x64xf32>
    %c2 = arith.constant 2 : index
    %c0_4 = arith.constant 0 : index
    %3 = vector.load %arg1[%c2, %c0_4] : memref<8x64xf32, #tpu.memory_space<vmem>>, vector<1x64xf32>
    %c3 = arith.constant 3 : index
    %c0_5 = arith.constant 0 : index
    %4 = vector.load %arg1[%c3, %c0_5] : memref<8x64xf32, #tpu.memory_space<vmem>>, vector<1x64xf32>
    %c4 = arith.constant 4 : index
    %c0_6 = arith.constant 0 : index
    %5 = vector.load %arg1[%c4, %c0_6] : memref<8x64xf32, #tpu.memory_space<vmem>>, vector<1x64xf32>
    %c5 = arith.constant 5 : index
    %c0_7 = arith.constant 0 : index
    %6 = vector.load %arg1[%c5, %c0_7] : memref<8x64xf32, #tpu.memory_space<vmem>>, vector<1x64xf32>
    %c6 = arith.constant 6 : index
    %c0_8 = arith.constant 0 : index
    %7 = vector.load %arg1[%c6, %c0_8] : memref<8x64xf32, #tpu.memory_space<vmem>>, vector<1x64xf32>
    %8 = vector.broadcast %0 : vector<15x1xf32> to vector<15x64xf32>
    %9 = vector.broadcast %1 : vector<1x64xf32> to vector<15x64xf32>
    %10 = arith.mulf %8, %9 : vector<15x64xf32>
    %11 = vector.broadcast %2 : vector<1x64xf32> to vector<15x64xf32>
    %12 = arith.addf %10, %11 : vector<15x64xf32>
    %cst = arith.constant 0.000000e+00 : f32
    %13 = vector.broadcast %cst : f32 to vector<15x64xf32>
    %14 = arith.maximumf %12, %13 : vector<15x64xf32>
    %15 = vector.broadcast %3 : vector<1x64xf32> to vector<15x64xf32>
    %16 = arith.mulf %14, %15 : vector<15x64xf32>
    %cst_9 = arith.constant dense<0.000000e+00> : vector<15xf32>
    %17 = vector.multi_reduction <add>, %16, %cst_9 [1] : vector<15x64xf32> to vector<15xf32>
    %18 = vector.shape_cast %17 : vector<15xf32> to vector<15x1xf32>
    %c0_10 = arith.constant 0 : index
    %19 = memref.load %arg2[%c0_10] : memref<3xf32, #tpu.memory_space<smem>>
    %20 = vector.broadcast %19 : f32 to vector<15x1xf32>
    %21 = arith.addf %18, %20 : vector<15x1xf32>
    %22 = vector.broadcast %4 : vector<1x64xf32> to vector<15x64xf32>
    %23 = arith.mulf %14, %22 : vector<15x64xf32>
    %cst_11 = arith.constant dense<0.000000e+00> : vector<15xf32>
    %24 = vector.multi_reduction <add>, %23, %cst_11 [1] : vector<15x64xf32> to vector<15xf32>
    %25 = vector.shape_cast %24 : vector<15xf32> to vector<15x1xf32>
    %c1_12 = arith.constant 1 : index
    %26 = memref.load %arg2[%c1_12] : memref<3xf32, #tpu.memory_space<smem>>
    %27 = vector.broadcast %26 : f32 to vector<15x1xf32>
    %28 = arith.addf %25, %27 : vector<15x1xf32>
    %29 = arith.mulf %21, %28 : vector<15x1xf32>
    %30 = vector.shape_cast %29 : vector<15x1xf32> to vector<1x15x1xf32>
    %cst_13 = arith.constant dense<0.000000e+00> : vector<1xf32>
    %31 = vector.multi_reduction <add>, %30, %cst_13 [1, 2] : vector<1x15x1xf32> to vector<1xf32>
    %32 = vector.shape_cast %31 : vector<1xf32> to vector<1x1x1xf32>
    %33 = vector.extract %32[0, 0, 0] : f32 from vector<1x1x1xf32>
    %34 = arith.mulf %21, %21 : vector<15x1xf32>
    %35 = vector.shape_cast %34 : vector<15x1xf32> to vector<1x15x1xf32>
    %cst_14 = arith.constant dense<0.000000e+00> : vector<1xf32>
    %36 = vector.multi_reduction <add>, %35, %cst_14 [1, 2] : vector<1x15x1xf32> to vector<1xf32>
    %37 = vector.shape_cast %36 : vector<1xf32> to vector<1x1x1xf32>
    %38 = vector.extract %37[0, 0, 0] : f32 from vector<1x1x1xf32>
    %39 = arith.mulf %28, %28 : vector<15x1xf32>
    %40 = vector.shape_cast %39 : vector<15x1xf32> to vector<1x15x1xf32>
    %cst_15 = arith.constant dense<0.000000e+00> : vector<1xf32>
    %41 = vector.multi_reduction <add>, %40, %cst_15 [1, 2] : vector<1x15x1xf32> to vector<1xf32>
    %42 = vector.shape_cast %41 : vector<1xf32> to vector<1x1x1xf32>
    %43 = vector.extract %42[0, 0, 0] : f32 from vector<1x1x1xf32>
    %cst_16 = arith.constant 1.000000e-16 : f32
    %44 = arith.maximumf %38, %cst_16 : f32
    %45 = math.rsqrt %44 : f32
    %46 = arith.mulf %33, %45 : f32
    %cst_17 = arith.constant 1.000000e-16 : f32
    %47 = arith.maximumf %43, %cst_17 : f32
    %48 = math.rsqrt %47 : f32
    %49 = arith.mulf %46, %48 : f32
    %50 = arith.subf %21, %28 : vector<15x1xf32>
    %51 = vector.broadcast %49 : f32 to vector<15x1xf32>
    %52 = arith.mulf %51, %50 : vector<15x1xf32>
    %53 = arith.addf %28, %52 : vector<15x1xf32>
    %54 = vector.broadcast %53 : vector<15x1xf32> to vector<15x64xf32>
    %55 = vector.broadcast %5 : vector<1x64xf32> to vector<15x64xf32>
    %56 = arith.mulf %54, %55 : vector<15x64xf32>
    %57 = vector.broadcast %6 : vector<1x64xf32> to vector<15x64xf32>
    %58 = arith.addf %56, %57 : vector<15x64xf32>
    %cst_18 = arith.constant 0.000000e+00 : f32
    %59 = vector.broadcast %cst_18 : f32 to vector<15x64xf32>
    %60 = arith.maximumf %58, %59 : vector<15x64xf32>
    %61 = vector.broadcast %7 : vector<1x64xf32> to vector<15x64xf32>
    %62 = arith.mulf %60, %61 : vector<15x64xf32>
    %cst_19 = arith.constant dense<0.000000e+00> : vector<15xf32>
    %63 = vector.multi_reduction <add>, %62, %cst_19 [1] : vector<15x64xf32> to vector<15xf32>
    %64 = vector.shape_cast %63 : vector<15xf32> to vector<15x1xf32>
    %c2_20 = arith.constant 2 : index
    %65 = memref.load %arg2[%c2_20] : memref<3xf32, #tpu.memory_space<smem>>
    %66 = vector.broadcast %65 : f32 to vector<15x1xf32>
    %67 = arith.addf %64, %66 : vector<15x1xf32>
    %c0_21 = arith.constant 0 : index
    %c0_22 = arith.constant 0 : index
    %68 = vector.load %arg3[%c0_21, %c0_22] : memref<15x1xf32, #tpu.memory_space<vmem>>, vector<15x1xf32>
    tpu.vector_store %arg3[%c0_21, %c0_22], %67 {strides = array<i32>} : memref<15x1xf32, #tpu.memory_space<vmem>>, vector<15x1xf32>,
    return
  }
}

</mosaic_0001>

<bundles_post_ra>
// kernel: tpu_custom_call.1
= control target key start
LH: loop header
LB: loop body
LE: loop exit
PB: predicated region body
PF: predicated region fallthrough
CT: control target
= control target key end

     0   :  { %8 = vsyncpa [#allocation3], 0  ;;  %s332_s0 = inlined_call_operand.vmem [shape: f32[15,1], index: 0, kind: input, shape index: {}]   ;;  %s333_s1 = inlined_call_operand.vmem [shape: f32[8,64], index: 1, kind: input, shape index: {}]   ;;  %s334_s2 = inlined_call_operand.vmem [shape: f32[3], index: 2, kind: input, shape index: {}]   ;;  %s335_s3 = inlined_call_operand.vmem [shape: f32[15,1], index: 3, kind: output, shape index: {}]  }
   0x1   :  { %s19_s14 = sshll.u32 %s334_s2, 4  ;;  %s20_s14 = int_to_ptr.vmem [resolvable:$true] %s19_s14 }
   0x2   :  { %s219_s15 = scalar_lea.vmem %s20_s14, 16  ;;  %p224_p1 = scmp.lt.s32.totalorder %s20_s14, %s20_s14 }
   0x3   :  { %p220_p0 = scmp.ne.s32.totalorder %s20_s14, %s219_s15  ;;  %p225_p2 = scmp.lt.s32.totalorder %s219_s15, %s219_s15 }
   0x5   :  { %p226_p3 = por %p225_p2, %p224_p1 }
   0x7   :  { %p227_p4 = pnand %p226_p3, %p220_p0 }
   0x9   :  { %230 = shalt.err (!%p227_p4)
}
   0xa   :  { %s233_s16 = smov [#allocation2]  }
   0xb   :  { %22 = dma.vmem_to_smem %s20_s14, 16, %s233_s16, [#allocation3]  }
   0xc   :  { %231 = dma.done.wait [#allocation3], 16  }
   0xd   :  { %232 = vsyncadd [#allocation3], 4294967280 }
   0xe   :  { %26 = sfence }
   0xf   :  { %v27_v0 = vld [vmem:[%s332_s0] sm:$0xff]  ;;  %v234_v1 = vmov 0   ;;  %v28_v2 = vld [vmem:[%s332_s0 + $0x8] sm:$0x7f]  ;;  %vm66_vm0 = vcmask 523264   ;;  %vm70_vm1 = vcmask 522240  }
  0x10   :  { %214 = vset.pattern.permute.xlu0 %v234_v1  ;;  %v192_v3 = vld [vmem:[%s333_s1] ss:$0 sm:$0xff]  ;;  %v193_v4 = vld [vmem:[%s333_s1 + $0x1] ss:$0 sm:$0xff]  ;;  %v195_v9 = vld [vmem:[%s333_s1 + $0x3] ss:$0 sm:$0xff] }
  0x11   :  { %38 = vperm.xlu0 %214, %v27_v0   ;;  %v194_v10 = vld [vmem:[%s333_s1 + $0x2] ss:$0 sm:$0xff]  ;;  %s74_s0 = sld [smem:[#allocation2]]  ;;  %vm96_vm2 = vcmask 7168   ;;  %vm98_vm3 = vcmask 6144  }
  0x12   :  { %s196_s28 = sld [smem:[#allocation2 + $0x1]]  ;;  %s235_s4 = smov 1e-16  }
  0x13   :  { %s200_s18 = sld [smem:[#allocation2 + $0x2]] }
  0x15   :  { %43 = vperm.xlu0 %214, %v28_v2  }
  0x17   :  { %v75_v24 = vstv %s74_s0 }
  0x18   :  { %v91_v25 = vstv %s196_s28 }
  0x8c   :  { %v39_v5 = vpop.permute.xlu0 %38 }
  0x8d   :  { %v50_v6 = vmul.f32 %v192_v3, %v39_v5 }
  0x8f   :  { %v56_v7 = vadd.f32 %v193_v4, %v50_v6 }
  0x90   :  { %v44_v8 = vpop.permute.xlu0 %43 }
  0x91   :  { %v58_v11 = vmax.f32 %v56_v7, 0.0  ;;  %v51_v12 = vmul.f32 %v192_v3, %v44_v8 }
  0x93   :  { %v57_v13 = vadd.f32 %v193_v4, %v51_v12  ;;  %v82_v14 = vmul.f32 %v195_v9, %v58_v11  ;;  %v64_v15 = vmul.f32 %v194_v10, %v58_v11 }
  0x95   :  { %v59_v16 = vmax.f32 %v57_v13, 0.0  ;;  %v84_v17 = vsel %vm66_vm0, %v82_v14, 0.0  ;;  %v67_v18 = vsel %vm66_vm0, %v64_v15, 0.0  ;;  %v197_v14 = vld [vmem:[%s333_s1 + $0x4] ss:$0 sm:$0xff] }
  0x96   :  { %85 = vadd.xlane.f32.xlu0 %v84_v17  ;;  %68 = vadd.xlane.f32.xlu1 %v67_v18  ;;  %v198_v17 = vld [vmem:[%s333_s1 + $0x5] ss:$0 sm:$0xff] }
  0x97   :  { %v65_v19 = vmul.f32 %v194_v10, %v59_v16  ;;  %v83_v21 = vmul.f32 %v195_v9, %v59_v16 }
  0x99   :  { %v71_v20 = vsel %vm70_vm1, %v65_v19, 0.0  ;;  %v87_v22 = vsel %vm70_vm1, %v83_v21, 0.0 }
  0x9a   :  { %72 = vadd.xlane.f32.xlu1 %v71_v20 }
  0x9e   :  { %88 = vadd.xlane.f32.xlu1 %v87_v22  ;;  %v199_v22 = vld [vmem:[%s333_s1 + $0x6] ss:$0 sm:$0xff] }
 0x11f   :  { %v69_v23 = vpop.xlane.xlu1 %68  ;;  %v86_v26 = vpop.xlane.xlu0 %85 }
 0x120   :  { %v281_v28 = vadd.f32 %v75_v24, %v69_v23  ;;  %v283_v29 = vadd.f32 %v91_v25, %v86_v26 }
 0x122   :  { %v94_v33 = vmul.f32 %v283_v29, %v281_v28  ;;  %v110_v38 = vmul.f32 %v281_v28, %v281_v28  ;;  %v124_v43 = vmul.f32 %v283_v29, %v283_v29  ;;  %v148_v9 = vsub.f32 %v281_v28, %v283_v29 }
 0x123   :  { %v73_v27 = vpop.xlane.xlu1 %72 }
 0x124   :  { %v285_v30 = vadd.f32 %v75_v24, %v73_v27  ;;  %v97_v36 = vsel %vm96_vm2, %v94_v33, 0.0  ;;  %v112_v42 = vsel %vm96_vm2, %v110_v38, 0.0  ;;  %v126_v46 = vsel %vm96_vm2, %v124_v43, 0.0 }
 0x126   :  { %v111_v35 = vmul.f32 %v285_v30, %v285_v30 }
 0x127   :  { %v89_v31 = vpop.xlane.xlu1 %88 }
 0x128   :  { %v287_v32 = vadd.f32 %v91_v25, %v89_v31  ;;  %v113_v40 = vsel %vm98_vm3, %v111_v35, 0.0 }
 0x129   :  { %v114_v44 = vadd.f32 %v113_v40, %v112_v42 }
 0x12a   :  { %v95_v34 = vmul.f32 %v287_v32, %v285_v30  ;;  %v125_v41 = vmul.f32 %v287_v32, %v287_v32  ;;  %v149_v10 = vsub.f32 %v285_v30, %v287_v32 }
 0x12c   :  { %v99_v37 = vsel %vm98_vm3, %v95_v34, 0.0  ;;  %v127_v45 = vsel %vm98_vm3, %v125_v41, 0.0 }
 0x12d   :  { %v100_v39 = vadd.f32 %v99_v37, %v97_v36  ;;  %v128_v47 = vadd.f32 %v127_v45, %v126_v46 }
 0x12f   :  { %101 = vadd.xlane.f32.xlu1 %v100_v39 }
 0x133   :  { %115 = vadd.xlane.f32.xlu1 %v114_v44 }
 0x137   :  { %129 = vadd.xlane.f32.xlu1 %v128_v47 }
 0x1b8   :  { %v102_v48 = vpop.xlane.xlu1 %101 }
 0x1b9   :  { %v103_v49 = vrot.slane %v102_v48, 4 }
 0x1bb   :  { %v104_v50 = vadd.f32 %v103_v49, %v102_v48 }
 0x1bc   :  { %v116_v51 = vpop.xlane.xlu1 %115 }
 0x1bd   :  { %v105_v52 = vrot.slane %v104_v50, 2  ;;  %v117_v53 = vrot.slane %v116_v51, 4 }
 0x1bf   :  { %v118_v54 = vadd.f32 %v117_v53, %v116_v51  ;;  %v106_v55 = vadd.f32 %v105_v52, %v104_v50 }
 0x1c0   :  { %v130_v56 = vpop.xlane.xlu1 %129 }
 0x1c1   :  { %v119_v57 = vrot.slane %v118_v54, 2  ;;  %v131_v58 = vrot.slane %v130_v56, 4  ;;  %v107_v59 = vrot.slane %v106_v55, 1 }
 0x1c3   :  { %v132_v60 = vadd.f32 %v131_v58, %v130_v56  ;;  %v108_v61 = vadd.f32 %v107_v59, %v106_v55  ;;  %v120_v62 = vadd.f32 %v119_v57, %v118_v54 }
 0x1c5   :  { %v133_v63 = vrot.slane %v132_v60, 2  ;;  %201 = vpush %v108_v61  ;;  %v121_v0 = vrot.slane %v120_v62, 1 }
 0x1c7   :  { %v122_v1 = vadd.f32 %v121_v0, %v120_v62  ;;  %v134_v2 = vadd.f32 %v133_v63, %v132_v60 }
 0x1c9   :  { %203 = vpush %v122_v1  ;;  %v135_v3 = vrot.slane %v134_v2, 1 }
 0x1cb   :  { %v136_v4 = vadd.f32 %v135_v3, %v134_v2 }
 0x1cd   :  { %205 = vpush %v136_v4 }
 0x1f6   :  { %s202_s29 = spop %201 }
 0x1fa   :  { %s204_s30 = spop %203 }
 0x1fb   :  { %s138_s5 = smax.f32 %s235_s4, %s204_s30 }
 0x1fc   :  { %v139_v5 = vstv %s138_s5 }
 0x1fd   :  { %215 = vrsqrt.f32 %v139_v5 }
 0x1fe   :  { %s206_s6 = spop %205 }
 0x1ff   :  { %s143_s7 = smax.f32 %s235_s4, %s206_s6 }
 0x200   :  { %v144_v6 = vstv %s143_s7 }
 0x201   :  { %217 = vrsqrt.f32 %v144_v6 }
 0x20a   :  { %v216_v7 = vpop.eup %215 }
 0x20b   :  { %207 = vpush %v216_v7 }
 0x20e   :  { %v218_v8 = vpop.eup %217 }
 0x20f   :  { %209 = vpush %v218_v8 }
 0x23c   :  { %s208_s8 = spop %207 }
 0x23d   :  { %s142_s9 = smul.f32 %s208_s8, %s202_s29 }
 0x240   :  { %s210_s10 = spop %209 }
 0x241   :  { %s147_s11 = smul.f32 %s210_s10, %s142_s9 }
 0x243   :  { %v150_v11 = vstv %s147_s11 }
 0x244   :  { %v151_v12 = vmul.f32 %v150_v11, %v148_v9  ;;  %v152_v13 = vmul.f32 %v150_v11, %v149_v10 }
 0x246   :  { %v153_v15 = vadd.f32 %v151_v12, %v283_v29  ;;  %v154_v16 = vadd.f32 %v152_v13, %v287_v32  ;;  %v182_v29 = vstv %s200_s18 }
 0x248   :  { %v159_v18 = vmul.f32 %v197_v14, %v153_v15  ;;  %v160_v19 = vmul.f32 %v197_v14, %v154_v16 }
 0x24a   :  { %v165_v20 = vadd.f32 %v198_v17, %v159_v18  ;;  %v166_v21 = vadd.f32 %v198_v17, %v160_v19 }
 0x24c   :  { %v167_v23 = vmax.f32 %v165_v20, 0.0  ;;  %v168_v24 = vmax.f32 %v166_v21, 0.0 }
 0x24e   :  { %v173_v25 = vmul.f32 %v199_v22, %v167_v23  ;;  %v174_v27 = vmul.f32 %v199_v22, %v168_v24 }
 0x250   :  { %v175_v26 = vsel %vm66_vm0, %v173_v25, 0.0  ;;  %v178_v28 = vsel %vm70_vm1, %v174_v27, 0.0 }
 0x251   :  { %176 = vadd.xlane.f32.xlu1 %v175_v26 }
 0x255   :  { %179 = vadd.xlane.f32.xlu1 %v178_v28 }
 0x2da   :  { %v177_v30 = vpop.xlane.xlu1 %176 }
 0x2db   :  { %v183_v31 = vadd.f32 %v182_v29, %v177_v30 }
 0x2dd   :  { %185 = vst.msk [vmem:[%s335_s3] sm:$0xff] %vm96_vm2, %v183_v31 }
 0x2de   :  { %v180_v32 = vpop.xlane.xlu1 %179 }
 0x2df   :  { %v184_v33 = vadd.f32 %v182_v29, %v180_v32 }
 0x2e1   :  { %186 = vst.msk [vmem:[%s335_s3 + $0x8] sm:$0x7f] %vm98_vm3, %v184_v33 }
 0x2e2   :  { %191 = vsyncpa [#allocation3], 1 }

</bundles_post_ra>
